<compile_context>
chip_gen: v6e
topology: v6e:2x2x1
jax: 0.10.0
libtpu: 0.0.40
codegen_flags: <defaults>
</compile_context>

<pallas_src>
import math
import jax
import jax.numpy as jnp
from jax import lax
from jax.experimental import pallas as pl
from jax.experimental.pallas import tpu as pltpu

# MXU operand dtype (accumulation always f32). Weights/activations are already stored bf16,
# so the in-kernel .astype() calls are no-ops; expect ~1e-2 relative deviation vs pure f32.
_MXU_DTYPE = jnp.bfloat16
_ACT_DTYPE = jnp.bfloat16   # inter-kernel activation storage dtype


# ----------------------------- small helpers -----------------------------

def _gelu_tanh(x):
    # tanh-form GELU (EUP tanh, no f32 divide on the VPU).
    # TODO(synk): if exact parity with an erf-based reference GELU is required, swap in
    # the erf form here (small systematic difference on the FF path otherwise).
    c = math.sqrt(2.0 / math.pi)
    return 0.5 * x * (1.0 + jnp.tanh(c * (x + 0.044715 * x * x * x)))


def _pick_tile(dim, pref, align):
    """Largest multiple of `align` that divides `dim` and is <= pref; else the full dim."""
    if dim <= pref:
        return dim
    t = (pref // align) * align
    while t >= align:
        if dim % t == 0:
            return t
        t -= align
    return dim


# ----------------------------- fused linear (matmul + bias [+ act]) -----------------------------

def _make_linear_kernel(act):
    def kernel(x_ref, w_ref, b_ref, o_ref, acc_ref):
        kk = pl.program_id(2)

        @pl.when(kk == 0)
        def _():
            acc_ref[...] = jnp.zeros_like(acc_ref)

        acc_ref[...] += jnp.dot(
            x_ref[...].astype(_MXU_DTYPE),
            w_ref[...].astype(_MXU_DTYPE),
            preferred_element_type=jnp.float32,
        )

        @pl.when(kk == pl.num_programs(2) - 1)
        def _():
            y = acc_ref[...] + b_ref[...]
            if act == "gelu":
                y = _gelu_tanh(y)
            elif act == "tanh":
                y = jnp.tanh(y)
            o_ref[...] = y.astype(o_ref.dtype)

    return kernel


def linear(x, w, b, act=None, out_dtype=_ACT_DTYPE):
    m, k = x.shape
    n = w.shape[1]
    tm = _pick_tile(m, 512, 16)      # bf16 activations -> 16-row sublane alignment
    tn = _pick_tile(n, 1024, 128)    # fewer x re-reads, lane-dense unmasked stores
    tk = _pick_tile(k, 1024, 128)
    return pl.pallas_call(
        _make_linear_kernel(act),
        out_shape=jax.ShapeDtypeStruct((m, n), out_dtype),
        grid=(m // tm, n // tn, k // tk),
        in_specs=[pl.BlockSpec((tm, tk), lambda i, j, kk: (i, kk)),
                  pl.BlockSpec((tk, tn), lambda i, j, kk: (kk, j)),
                  pl.BlockSpec((1, tn), lambda i, j, kk: (0, j))],
        out_specs=pl.BlockSpec((tm, tn), lambda i, j, kk: (i, j)),
        scratch_shapes=[pltpu.VMEM((tm, tn), jnp.float32)],
        compiler_params=pltpu.CompilerParams(
            dimension_semantics=("parallel", "parallel", "arbitrary")),
    )(x, w, b.reshape(1, n))


# ----------------------------- fused linear + residual-add + LayerNorm -----------------------------

def _linear_res_ln_kernel(x_ref, w_ref, b_ref, r_ref, g_ref, bb_ref, o_ref, acc_ref):
    kk = pl.program_id(1)

    @pl.when(kk == 0)
    def _():
        acc_ref[...] = jnp.zeros_like(acc_ref)

    acc_ref[...] += jnp.dot(
        x_ref[...].astype(_MXU_DTYPE),
        w_ref[...].astype(_MXU_DTYPE),
        preferred_element_type=jnp.float32,
    )

    @pl.when(kk == pl.num_programs(1) - 1)
    def _():
        # residual add + LayerNorm, all in f32.
        y = acc_ref[...] + b_ref[...] + r_ref[...].astype(jnp.float32)
        u = jnp.mean(y, axis=-1, keepdims=True)
        var = jnp.mean(jnp.square(y - u), axis=-1, keepdims=True)
        yn = (y - u) * lax.rsqrt(var + 1e-12)                 # biased var, eps=1e-12 (matches ref)
        o_ref[...] = (g_ref[...] * yn + bb_ref[...]).astype(o_ref.dtype)


def linear_residual_ln(x, w, b, res, gamma, beta, out_dtype=_ACT_DTYPE):
    m, k = x.shape
    n = w.shape[1]
    tm = _pick_tile(m, 512, 16)
    # K block kept at <=512 here: the weight block is (tk, full-N) and three (tm, N) slabs
    # (residual, acc, out) are also resident -- keeps the footprint small for v7x's 64 MiB.
    tk = _pick_tile(k, 512, 128)
    return pl.pallas_call(
        _linear_res_ln_kernel,
        out_shape=jax.ShapeDtypeStruct((m, n), out_dtype),
        grid=(m // tm, k // tk),
        in_specs=[pl.BlockSpec((tm, tk), lambda i, kk: (i, kk)),
                  pl.BlockSpec((tk, n), lambda i, kk: (kk, 0)),
                  pl.BlockSpec((1, n), lambda i, kk: (0, 0)),
                  pl.BlockSpec((tm, n), lambda i, kk: (i, 0)),
                  pl.BlockSpec((1, n), lambda i, kk: (0, 0)),
                  pl.BlockSpec((1, n), lambda i, kk: (0, 0))],
        out_specs=pl.BlockSpec((tm, n), lambda i, kk: (i, 0)),
        scratch_shapes=[pltpu.VMEM((tm, n), jnp.float32)],
        compiler_params=pltpu.CompilerParams(
            dimension_semantics=("parallel", "arbitrary")),
    )(x, w, b.reshape(1, n), res, gamma.reshape(1, n), beta.reshape(1, n))


# ----------------------------- plain LayerNorm (embedding, no residual) -----------------------------

def _ln_kernel(x_ref, g_ref, b_ref, o_ref):
    x = x_ref[...].astype(jnp.float32)
    u = jnp.mean(x, axis=-1, keepdims=True)
    var = jnp.mean(jnp.square(x - u), axis=-1, keepdims=True)
    xn = (x - u) * lax.rsqrt(var + 1e-12)
    o_ref[...] = (g_ref[...] * xn + b_ref[...]).astype(o_ref.dtype)


def layer_norm(x, gamma, beta, out_dtype=_ACT_DTYPE):
    m, d = x.shape
    tm = _pick_tile(m, 512, 16)   # memory-bound: bigger row tile -> closer to HBM roofline
    return pl.pallas_call(
        _ln_kernel,
        out_shape=jax.ShapeDtypeStruct((m, d), out_dtype),
        grid=(m // tm,),
        in_specs=[pl.BlockSpec((tm, d), lambda i: (i, 0)),
                  pl.BlockSpec((1, d), lambda i: (0, 0)),
                  pl.BlockSpec((1, d), lambda i: (0, 0))],
        out_specs=pl.BlockSpec((tm, d), lambda i: (i, 0)),
        compiler_params=pltpu.CompilerParams(dimension_semantics=("parallel",)),
    )(x, gamma.reshape(1, d), beta.reshape(1, d))


# ----------------------------- attention (all heads per batch, fused QKV slab) -----------------------------

def _make_attn_kernel(H, Dh):
    D = H * Dh
    scale = 1.0 / math.sqrt(Dh)

    def kernel(qkv_ref, m_ref, o_ref):
        qkv = qkv_ref[0]                       # [S, 3D] bf16 (already MXU dtype, no casts)
        mask = m_ref[0]                        # [1, S] f32  (1 = keep, 0 = pad)
        neg = -10000.0 * (1.0 - mask)          # same additive masking as torch ref
        for h in range(H):                     # static head loop; slices are free views in VMEM
            # fold 1/sqrt(Dh) into the [S, Dh] Q operand (not the [S, S] score matrix)
            q = (qkv[:, h * Dh:(h + 1) * Dh] * scale).astype(_MXU_DTYPE)
            k = qkv[:, D + h * Dh:D + (h + 1) * Dh]
            v = qkv[:, 2 * D + h * Dh:2 * D + (h + 1) * Dh]
            s = lax.dot_general(q, k, (((1,), (1,)), ((), ())),
                                preferred_element_type=jnp.float32)          # [S, S] f32
            s = s + neg
            s = s - jnp.max(s, axis=-1, keepdims=True)          # stable softmax (equivalent)
            p = jnp.exp(s)
            p = p * pl.reciprocal(jnp.sum(p, axis=-1, keepdims=True), approx=True)
            pv = jnp.dot(p.astype(_MXU_DTYPE), v, preferred_element_type=jnp.float32)
            # direct per-head store into the lane-dense [S, D] output (no concat at the end)
            o_ref[0, :, h * Dh:(h + 1) * Dh] = pv.astype(o_ref.dtype)

    return kernel


def attention(qkv, mask_b, H, Dh):
    B, S, D3 = qkv.shape
    D = D3 // 3
    return pl.pallas_call(
        _make_attn_kernel(H, Dh),
        out_shape=jax.ShapeDtypeStruct((B, S, D), _ACT_DTYPE),
        grid=(B,),
        in_specs=[pl.BlockSpec((1, S, D3), lambda b: (b, 0, 0)),
                  pl.BlockSpec((1, 1, S), lambda b: (b, 0, 0))],
        out_specs=pl.BlockSpec((1, S, D), lambda b: (b, 0, 0)),
        compiler_params=pltpu.CompilerParams(dimension_semantics=("parallel",)),
    )(qkv, mask_b)


# ----------------------------- fused pooler + classifier head -----------------------------

def _pool_cls_kernel(h0_ref, wp_ref, bp_ref, wc_ref, bc_ref, o_ref):
    pooled = jnp.tanh(
        jnp.dot(h0_ref[...].astype(_MXU_DTYPE), wp_ref[...].astype(_MXU_DTYPE),
                preferred_element_type=jnp.float32) + bp_ref[...])
    o_ref[...] = (jnp.dot(pooled.astype(_MXU_DTYPE), wc_ref[...].astype(_MXU_DTYPE),
                          preferred_element_type=jnp.float32) + bc_ref[...]).astype(o_ref.dtype)


def pool_and_classify(h0, wp, bp, wc, bc):
    # pooled = tanh(h0 @ wp + bp); logits = pooled @ wc + bc   -- one pallas_call, no HBM
    # round-trip of `pooled`. Dropout(p_drop_hidden) is identity at inference.
    B, D = h0.shape
    n_labels = wc.shape[1]
    return pl.pallas_call(
        _pool_cls_kernel,
        out_shape=jax.ShapeDtypeStruct((B, n_labels), jnp.float32),
        grid=(1,),
        in_specs=[pl.BlockSpec((B, D), lambda i: (0, 0)),
                  pl.BlockSpec((D, D), lambda i: (0, 0)),
                  pl.BlockSpec((1, D), lambda i: (0, 0)),
                  pl.BlockSpec((D, n_labels), lambda i: (0, 0)),
                  pl.BlockSpec((1, n_labels), lambda i: (0, 0))],
        out_specs=pl.BlockSpec((B, n_labels), lambda i: (0, 0)),
        compiler_params=pltpu.CompilerParams(dimension_semantics=("arbitrary",)),
    )(h0, wp, bp.reshape(1, D), wc, bc.reshape(1, n_labels))


# ----------------------------- model glue (plain JAX: reshapes, gathers, wiring) -----------------------------

def encoder_block(h_flat, mask_b, p, B, S, H):
    D = h_flat.shape[-1]
    Dh = D // H
    qkv = linear(h_flat, p["wqkv"], p["bqkv"])                 # fused Q|K|V projection, [B*S, 3D] bf16
    ctx = attention(qkv.reshape(B, S, 3 * D), mask_b, H, Dh)   # [B, S, D] bf16
    ctx_flat = ctx.reshape(B * S, D)
    h1 = linear_residual_ln(ctx_flat, p["wo"], p["bo"], h_flat, p["g1"], p["b1"])  # norm1(x + proj)
    ff1 = linear(h1, p["wf1"], p["bf1"], act="gelu")
    h2 = linear_residual_ln(ff1, p["wf2"], p["bf2"], h1, p["g2"], p["b2"])         # norm2(h + pwff(h))
    return h2


def classifier_forward(params, input_ids, segment_ids, input_mask, n_heads):
    B, S = input_ids.shape
    D = params["tok_embed"].shape[1]
    H = n_heads

    # Embeddings: token + position + segment (bf16 tables -> half the gather traffic),
    # then LayerNorm in f32 (no residual path -> no zero slab).
    # TODO(synk): embedding gather stays in plain JAX (data-dependent gather; a Pallas version
    # would need scalar-prefetch / manual DMA indexing).
    e = (jnp.take(params["tok_embed"], input_ids, axis=0)
         + params["pos_embed"][None, :S, :]
         + jnp.take(params["seg_embed"], segment_ids, axis=0))
    h = layer_norm(e.reshape(B * S, D), params["emb_g"], params["emb_b"])

    mask_b = input_mask.astype(jnp.float32).reshape(B, 1, S)   # no per-head replication

    for p in params["layers"]:
        h = encoder_block(h, mask_b, p, B, S, H)

    h = h.reshape(B, S, D)
    logits = pool_and_classify(h[:, 0, :], params["pool_w"], params["pool_b"],
                               params["cls_w"], params["cls_b"])
    return logits


# ----------------------------- deterministic parameter init -----------------------------

def init_params(key, *, vocab, max_len, n_segments, dim, dim_ff, n_layers, n_labels):
    kit = iter(jax.random.split(key, 8 + 16 * n_layers + 8))

    def nrm(shape):
        # weights stored bf16 in HBM; all accumulation happens in f32 in-kernel
        return (0.02 * jax.random.normal(next(kit), shape, jnp.float32)).astype(jnp.bfloat16)

    params = {
        "tok_embed": nrm((vocab, dim)),
        "pos_embed": nrm((max_len, dim)),
        "seg_embed": nrm((n_segments, dim)),
        "emb_g": jnp.ones((dim,), jnp.float32),
        "emb_b": jnp.zeros((dim,), jnp.float32),
        "layers": [],
        "pool_w": nrm((dim, dim)),
        "pool_b": jnp.zeros((dim,), jnp.float32),
        "cls_w": nrm((dim, n_labels)),
        "cls_b": jnp.zeros((n_labels,), jnp.float32),
    }
    for _ in range(n_layers):
        params["layers"].append({
            # fused Q|K|V projection weight / bias
            "wqkv": nrm((dim, 3 * dim)), "bqkv": jnp.zeros((3 * dim,), jnp.float32),
            "wo": nrm((dim, dim)), "bo": jnp.zeros((dim,), jnp.float32),
            "g1": jnp.ones((dim,), jnp.float32), "b1": jnp.zeros((dim,), jnp.float32),
            "wf1": nrm((dim, dim_ff)), "bf1": jnp.zeros((dim_ff,), jnp.float32),
            "wf2": nrm((dim_ff, dim)), "bf2": jnp.zeros((dim,), jnp.float32),
            "g2": jnp.ones((dim,), jnp.float32), "b2": jnp.zeros((dim,), jnp.float32),
        })
    return params


# ----------------------------- main -----------------------------

if __name__ == "__main__":
    # Small config: dim=32, heads=4, ff=64, layers=2, vocab=32, seq=8, batch=2, labels=3.
    B, S, D, H, FF, L, V, NSEG, NLAB = 2, 8, 32, 4, 64, 2, 32, 2, 3

    key = jax.random.PRNGKey(0)
    k_par, k_ids, k_seg = jax.random.split(key, 3)

    params = init_params(k_par, vocab=V, max_len=S, n_segments=NSEG,
                         dim=D, dim_ff=FF, n_layers=L, n_labels=NLAB)

    input_ids = jax.random.randint(k_ids, (B, S), 0, V, dtype=jnp.int32)
    segment_ids = jax.random.randint(k_seg, (B, S), 0, NSEG, dtype=jnp.int32)
    input_mask = jnp.ones((B, S), jnp.int32).at[:, S - 2:].set(0)  # last 2 tokens padded

    logits = classifier_forward(params, input_ids, segment_ids, input_mask, n_heads=H)
    logits = jax.block_until_ready(logits)
    assert logits.shape == (B, NLAB) and logits.dtype == jnp.float32
    assert bool(jnp.all(jnp.isfinite(logits)))
    print("KERNEL_OK")
</pallas_src>

<mosaic_0001>
module attributes {stable_mosaic.version = 11 : i64} {
  func.func @_ln_kernel(%arg0: i32, %arg1: memref<16x32xbf16, #tpu.memory_space<vmem>>, %arg2: memref<1x32xf32, #tpu.memory_space<vmem>>, %arg3: memref<1x32xf32, #tpu.memory_space<vmem>>, %arg4: memref<16x32xbf16, #tpu.memory_space<vmem>>) attributes {dimension_semantics = [#tpu.dimension_semantics<parallel>], iteration_bounds = array<i64: 1>, scalar_prefetch = 0 : i64, scratch_operands = 0 : i64, tpu.core_type = #tpu.core_type<tc>, window_params = [{transform_indices = @transform_0, window_bounds = array<i64: 16, 32>}, {pipeline_mode = #tpu.pipeline_mode<synchronous>, transform_indices = @transform_1, window_bounds = array<i64: 1, 32>}, {pipeline_mode = #tpu.pipeline_mode<synchronous>, transform_indices = @transform_2, window_bounds = array<i64: 1, 32>}, {transform_indices = @transform_3, window_bounds = array<i64: 16, 32>}]} {
    %c0 = arith.constant 0 : index
    %c0_0 = arith.constant 0 : index
    %0 = vector.load %arg1[%c0, %c0_0] : memref<16x32xbf16, #tpu.memory_space<vmem>>, vector<16x32xbf16>
    %1 = arith.extf %0 : vector<16x32xbf16> to vector<16x32xf32>
    %cst = arith.constant dense<0.000000e+00> : vector<16xf32>
    %2 = vector.multi_reduction <add>, %1, %cst [1] : vector<16x32xf32> to vector<16xf32>
    %3 = vector.shape_cast %2 : vector<16xf32> to vector<16x1xf32>
    %cst_1 = arith.constant 3.200000e+01 : f32
    %4 = vector.broadcast %cst_1 : f32 to vector<16x1xf32>
    %5 = arith.divf %3, %4 : vector<16x1xf32>
    %6 = vector.broadcast %5 : vector<16x1xf32> to vector<16x32xf32>
    %7 = arith.subf %1, %6 : vector<16x32xf32>
    %8 = arith.mulf %7, %7 : vector<16x32xf32>
    %cst_2 = arith.constant dense<0.000000e+00> : vector<16xf32>
    %9 = vector.multi_reduction <add>, %8, %cst_2 [1] : vector<16x32xf32> to vector<16xf32>
    %10 = vector.shape_cast %9 : vector<16xf32> to vector<16x1xf32>
    %cst_3 = arith.constant 3.200000e+01 : f32
    %11 = vector.broadcast %cst_3 : f32 to vector<16x1xf32>
    %12 = arith.divf %10, %11 : vector<16x1xf32>
    %13 = vector.broadcast %5 : vector<16x1xf32> to vector<16x32xf32>
    %14 = arith.subf %1, %13 : vector<16x32xf32>
    %cst_4 = arith.constant 9.99999996E-13 : f32
    %15 = vector.broadcast %cst_4 : f32 to vector<16x1xf32>
    %16 = arith.addf %12, %15 : vector<16x1xf32>
    %17 = math.rsqrt %16 : vector<16x1xf32>
    %18 = vector.broadcast %17 : vector<16x1xf32> to vector<16x32xf32>
    %19 = arith.mulf %14, %18 : vector<16x32xf32>
    %c0_5 = arith.constant 0 : index
    %c0_6 = arith.constant 0 : index
    %20 = vector.load %arg2[%c0_5, %c0_6] : memref<1x32xf32, #tpu.memory_space<vmem>>, vector<1x32xf32>
    %21 = vector.broadcast %20 : vector<1x32xf32> to vector<16x32xf32>
    %22 = arith.mulf %21, %19 : vector<16x32xf32>
    %c0_7 = arith.constant 0 : index
    %c0_8 = arith.constant 0 : index
    %23 = vector.load %arg3[%c0_7, %c0_8] : memref<1x32xf32, #tpu.memory_space<vmem>>, vector<1x32xf32>
    %24 = vector.broadcast %23 : vector<1x32xf32> to vector<16x32xf32>
    %25 = arith.addf %22, %24 : vector<16x32xf32>
    %26 = arith.truncf %25 : vector<16x32xf32> to vector<16x32xbf16>
    %c0_9 = arith.constant 0 : index
    %c0_10 = arith.constant 0 : index
    %27 = vector.load %arg4[%c0_9, %c0_10] : memref<16x32xbf16, #tpu.memory_space<vmem>>, vector<16x32xbf16>
    tpu.vector_store %arg4[%c0_9, %c0_10], %26 {strides = array<i32>} : memref<16x32xbf16, #tpu.memory_space<vmem>>, vector<16x32xbf16>,
    return
  }
  func.func @transform_0(%arg0: i32) -> (i32, i32) {
    %c0_i32 = arith.constant 0 : i32
    %c0_i32_0 = arith.constant 0 : i32
    return %arg0, %c0_i32 : i32, i32
  }
  func.func @transform_1(%arg0: i32) -> (i32, i32) {
    %c0_i32 = arith.constant 0 : i32
    %c0_i32_0 = arith.constant 0 : i32
    %c0_i32_1 = arith.constant 0 : i32
    return %c0_i32, %c0_i32_0 : i32, i32
  }
  func.func @transform_2(%arg0: i32) -> (i32, i32) {
    %c0_i32 = arith.constant 0 : i32
    %c0_i32_0 = arith.constant 0 : i32
    %c0_i32_1 = arith.constant 0 : i32
    return %c0_i32, %c0_i32_0 : i32, i32
  }
  func.func @transform_3(%arg0: i32) -> (i32, i32) {
    %c0_i32 = arith.constant 0 : i32
    %c0_i32_0 = arith.constant 0 : i32
    return %arg0, %c0_i32 : i32, i32
  }
}

</mosaic_0001>

<bundles_post_ra>
// kernel: tpu_custom_call.1
= control target key start
LH: loop header
LB: loop body
LE: loop exit
PB: predicated region body
PF: predicated region fallthrough
CT: control target
= control target key end

     0   :  { %8 = vsyncpa [#allocation3], 0  ;;  %s215_s0 = inlined_call_operand.hbm [shape: bf16[16,32], index: 0, kind: input, shape index: {}]   ;;  %s216_s1 = inlined_call_operand.vmem [shape: f32[1,32], index: 1, kind: input, shape index: {}]   ;;  %s217_s2 = inlined_call_operand.vmem [shape: f32[1,32], index: 2, kind: input, shape index: {}]   ;;  %s218_s3 = inlined_call_operand.hbm [shape: bf16[16,32], index: 3, kind: output, shape index: {}]  }
   0x1   :  { %9 = vsyncpa [#allocation4], 0  ;;  %s169_s12 = smov [#allocation2]  }
   0x2   :  { %s15_s13 = sshll.u32 %s169_s12, 4  ;;  %s16_s13 = int_to_ptr.vmem [resolvable:$true] %s15_s13 }
   0x3   :  { %s133_s14 = scalar_lea.vmem %s16_s13, 128  ;;  %p138_p1 = scmp.lt.s32.totalorder %s16_s13, %s16_s13 }
   0x4   :  { %p134_p0 = scmp.ne.s32.totalorder %s16_s13, %s133_s14  ;;  %p139_p2 = scmp.lt.s32.totalorder %s133_s14, %s133_s14 }
   0x6   :  { %p140_p3 = por %p139_p2, %p138_p1 }
   0x8   :  { %p141_p4 = pnand %p140_p3, %p134_p0 }
   0xa   :  { %144 = shalt.err (!%p141_p4)
}
   0xb   :  { %s170_s15 = smov 64   ;;  %s171_s16 = smov 4  }
   0xc   :  { %21 = dma.hbm_to_vmem [thread:$0]  %s215_s0, 128, %s16_s13, [#allocation3], %s170_s15, %s170_s15, %s171_s16  }
   0xd   :  { %165 = dma.done.wait [#allocation3], 128  }
   0xe   :  { %166 = vsyncadd [#allocation3], 4294967168  ;;  %v114_v0 = vld [vmem:[#allocation2] sm:$0xff]   ;;  %vm33_vm0 = vcmask 261120   ;;  %vm87_vm1 = vcmask 257024   ;;  %s172_s22 = smov [#allocation5]  }
   0xf   :  { %v115_v1 = vunpack.c.l.bf16 %v114_v0  ;;  %v116_v2 = vunpack.c.h.bf16 %v114_v0  ;;  %v107_v22 = vld [vmem:[%s216_s1] ss:$0 sm:$0xff]  ;;  %s95_s23 = sshll.u32 %s172_s22, 4  ;;  %s96_s23 = int_to_ptr.vmem [resolvable:$true] %s95_s23 }
  0x10   :  { %v108_v24 = vld [vmem:[%s217_s2] ss:$0 sm:$0xff]  ;;  %s145_s1 = scalar_lea.vmem %s96_s23, 128  ;;  %p150_p6 = scmp.lt.s32.totalorder %s96_s23, %s96_s23 }
  0x11   :  { %v34_v3 = vsel %vm33_vm0, %v115_v1, 0.0  ;;  %v37_v4 = vsel %vm33_vm0, %v116_v2, 0.0  ;;  %p146_p5 = scmp.ne.s32.totalorder %s96_s23, %s145_s1  ;;  %p151_p7 = scmp.lt.s32.totalorder %s145_s1, %s145_s1 }
  0x12   :  { %35 = vadd.xlane.f32.xlu0 %v34_v3 }
  0x13   :  { %p152_p8 = por %p151_p7, %p150_p6 }
  0x15   :  { %p153_p9 = pnand %p152_p8, %p146_p5 }
  0x16   :  { %38 = vadd.xlane.f32.xlu0 %v37_v4 }
  0x9b   :  { %v36_v5 = vpop.xlane.xlu0 %35 }
  0x9c   :  { %v41_v6 = vmul.f32 0.03125, %v36_v5 }
  0x9e   :  { %v43_v7 = vsub.f32 %v115_v1, %v41_v6 }
  0x9f   :  { %v39_v8 = vpop.xlane.xlu0 %38 }
  0xa0   :  { %v42_v9 = vmul.f32 0.03125, %v39_v8  ;;  %v45_v10 = vmul.f32 %v43_v7, %v43_v7 }
  0xa2   :  { %v44_v11 = vsub.f32 %v116_v2, %v42_v9  ;;  %v47_v12 = vsel %vm33_vm0, %v45_v10, 0.0 }
  0xa3   :  { %48 = vadd.xlane.f32.xlu1 %v47_v12 }
  0xa4   :  { %v46_v13 = vmul.f32 %v44_v11, %v44_v11 }
  0xa6   :  { %v50_v14 = vsel %vm33_vm0, %v46_v13, 0.0 }
  0xa7   :  { %51 = vadd.xlane.f32.xlu1 %v50_v14 }
 0x12c   :  { %v49_v15 = vpop.xlane.xlu1 %48 }
 0x12d   :  { %v53_v16 = vmul.f32 0.03125, %v49_v15 }
 0x12f   :  { %v55_v17 = vadd.f32 1e-12, %v53_v16 }
 0x130   :  { %v52_v18 = vpop.xlane.xlu1 %51 }
 0x131   :  { %121 = vrsqrt.f32 %v55_v17  ;;  %v54_v19 = vmul.f32 0.03125, %v52_v18 }
 0x133   :  { %v56_v20 = vadd.f32 1e-12, %v54_v19 }
 0x135   :  { %123 = vrsqrt.f32 %v56_v20 }
 0x13e   :  { %v122_v21 = vpop.eup %121 }
 0x13f   :  { %v59_v23 = vmul.f32 %v122_v21, %v43_v7 }
 0x141   :  { %v68_v25 = vmul.f32 %v107_v22, %v59_v23 }
 0x142   :  { %v124_v26 = vpop.eup %123 }
 0x143   :  { %v60_v27 = vmul.f32 %v124_v26, %v44_v11  ;;  %v77_v28 = vadd.f32 %v108_v24, %v68_v25 }
 0x145   :  { %v69_v29 = vmul.f32 %v107_v22, %v60_v27  ;;  %v111_v30 = vpack.c.bf16 %v77_v28, %v77_v28 }
 0x147   :  { %v78_v31 = vadd.f32 %v108_v24, %v69_v29  ;;  %88 = vst.msk [vmem:[#allocation5] sm:$0xf] %vm87_vm1, %v111_v30 }
 0x149   :  { %v112_v32 = vpack.c.bf16 %v78_v31, %v78_v31 }
 0x14b   :  { %89 = vst.msk [vmem:[#allocation5 + $0x4] sm:$0xf] %vm87_vm1, %v112_v32 }
 0x14c   :  { %156 = shalt.err (!%p153_p9)
}
 0x14d   :  { %101 = dma.vmem_to_hbm [thread:$0]  %s96_s23, 128, %s218_s3, [#allocation4], %s170_s15, %s170_s15, %s171_s16  }
 0x14e   :  { %167 = dma.done.wait [#allocation4], 128  }
 0x14f   :  { %168 = vsyncadd [#allocation4], 4294967168 }
 0x150   :  { %105 = vsyncpa [#allocation3], 1 }
 0x151   :  { %106 = vsyncpa [#allocation4], 1 }

</bundles_post_ra>
